<compile_context>
chip_gen: v7x
topology: tpu7x:2x2x1
jax: 0.10.0
libtpu: 0.0.40
codegen_flags: <defaults>
</compile_context>

<pallas_src>
import functools

import jax
import jax.numpy as jnp
from jax import lax
from jax.experimental import pallas as pl
from jax.experimental.pallas import tpu as pltpu


# Explicit scoped-VMEM limit: raises the 16 MiB default on v5e, leaves ~16 MiB headroom
# below v7x's 64 MiB physical VMEM.
_VMEM_LIMIT_BYTES = 48 * 1024 * 1024


# --------------------------------------------------------------------------------------
# Stage 1: fused QKV projection (1x1 conv == channel matmul), one grid step per batch.
# --------------------------------------------------------------------------------------
def _qkv_proj_kernel(x_ref, w_ref, q_ref, k_ref, v_ref, *, d):
    # x_ref: (1, D, L); w_ref: (3D, D) resident across the whole grid.
    x = x_ref[0]                                                   # (D, L)
    w = w_ref[...]                                                 # (3D, D)
    qkv = jnp.dot(w, x, preferred_element_type=jnp.float32)       # (3D, L), f32 accumulate
    q_ref[0] = qkv[:d].astype(q_ref.dtype)                        # scale already folded into Wq
    k_ref[0] = qkv[d:2 * d].astype(k_ref.dtype)
    v_ref[0] = qkv[2 * d:].astype(v_ref.dtype)


# --------------------------------------------------------------------------------------
# Stage 2: flash-attention with online softmax, channels-first (Dh on sublanes, L on lanes).
# --------------------------------------------------------------------------------------
def _flash_attn_kernel(q_ref, k_ref, v_ref, o_ref, m_sc, l_sc, acc_sc):
    ki = pl.program_id(3)                                          # kv-tile axis (innermost)

    @pl.when(ki == 0)
    def _():
        m_sc[...] = jnp.full_like(m_sc, -jnp.inf)
        l_sc[...] = jnp.zeros_like(l_sc)
        acc_sc[...] = jnp.zeros_like(acc_sc)

    q = q_ref[0, 0]                                                # (Dh, tq)
    k = k_ref[0, 0]                                                # (Dh, tk)
    v = v_ref[0, 0]                                                # (Dh, tk)

    # s_T[j, i] = sum_d k[d, j] * q[d, i]  (== scores[i, j]); contraction over the leading
    # Dh axis is folded into the MXU feed -- no explicit q.T materialization.
    s_t = lax.dot_general(k, q, (((0,), (0,)), ((), ())),
                          preferred_element_type=jnp.float32)      # (tk, tq), f32

    # Online softmax over the kv axis (axis 0 of s_t).  Stats are (1, tq): lane-indexed by
    # the query position, so they broadcast for free against the (Dh, tq) accumulator.
    m_prev = m_sc[...]                                             # (1, tq)
    m_new = jnp.maximum(m_prev, jnp.max(s_t, axis=0, keepdims=True))
    alpha = jnp.exp(m_prev - m_new)                                # (1, tq)
    p_t = jnp.exp(s_t - m_new)                                     # (tk, tq), f32

    l_sc[...] = alpha * l_sc[...] + jnp.sum(p_t, axis=0, keepdims=True)

    # pv[d, i] = sum_j v[d, j] * p_t[j, i]  -- plain matmul, no p.T materialization.
    pv = jnp.dot(v, p_t.astype(v.dtype), preferred_element_type=jnp.float32)   # (Dh, tq)
    acc_sc[...] = alpha * acc_sc[...] + pv
    m_sc[...] = m_new

    @pl.when(ki == pl.num_programs(3) - 1)
    def _():
        inv_l = pl.reciprocal(l_sc[...], approx=True)              # EUP slot, ~free
        o_ref[0, 0] = (acc_sc[...] * inv_l).astype(o_ref.dtype)    # (Dh, tq), lane-dense store


def _pick_seq_tile(length, preferred=512):
    """Largest multiple-of-128 divisor of `length` <= preferred, else the full length."""
    if length <= preferred:
        return length
    for t in range(preferred, 127, -128):
        if length % t == 0:
            return t
    return length


def attention_forward(x, w_qkv, n_heads, *, matmul_dtype=None, q_tile=None, kv_tile=None):
    """x: (B, D, L); w_qkv: (3*D, D, 1) Conv1d weight. Returns (B, D, L)."""
    B, D, L = x.shape
    H = n_heads
    assert D % H == 0
    Dh = D // H
    scale = float(D) ** (-0.5)     # matches PyTorch module: dim**-0.5 (full dim, not per-head)

    # (3D, D, 1) -> (3D, D); fold the softmax scale into the Wq rows (one-time host transform).
    w2d = w_qkv[..., 0]
    w2d = w2d.at[:D].multiply(scale)

    inter_dtype = matmul_dtype if matmul_dtype is not None else x.dtype
    if matmul_dtype is not None:
        x_in = x.astype(matmul_dtype)
        w_in = w2d.astype(matmul_dtype)
    else:
        x_in, w_in = x, w2d

    # ---- Stage 1: fused QKV projection, grid over batch; weight resident via constant index.
    q, k, v = pl.pallas_call(
        functools.partial(_qkv_proj_kernel, d=D),
        out_shape=tuple(jax.ShapeDtypeStruct((B, D, L), inter_dtype) for _ in range(3)),
        grid_spec=pltpu.PrefetchScalarGridSpec(
            num_scalar_prefetch=0,
            grid=(B,),
            in_specs=[
                pl.BlockSpec((1, D, L), lambda b: (b, 0, 0)),       # x[b]
                pl.BlockSpec((3 * D, D), lambda b: (0, 0)),         # stacked W, resident
            ],
            out_specs=[
                pl.BlockSpec((1, D, L), lambda b: (b, 0, 0)),
                pl.BlockSpec((1, D, L), lambda b: (b, 0, 0)),
                pl.BlockSpec((1, D, L), lambda b: (b, 0, 0)),
            ],
        ),
        compiler_params=pltpu.CompilerParams(
            dimension_semantics=("parallel",),
            vmem_limit_bytes=_VMEM_LIMIT_BYTES,
        ),
    )(x_in, w_in)

    # (B, D, L) -> (B, H, Dh, L): pure reshape (contiguous head split), no data movement.
    q = q.reshape(B, H, Dh, L)
    k = k.reshape(B, H, Dh, L)
    v = v.reshape(B, H, Dh, L)

    # ---- Stage 2: flash attention over (batch, head, q tiles, kv tiles).
    tq = q_tile if q_tile is not None else _pick_seq_tile(L)
    tk = kv_tile if kv_tile is not None else _pick_seq_tile(L)
    assert L % tq == 0 and L % tk == 0, "sequence length must be divisible by the tiles"
    nq, nk = L // tq, L // tk

    out_heads = pl.pallas_call(
        _flash_attn_kernel,
        out_shape=jax.ShapeDtypeStruct((B, H, Dh, L), x.dtype),
        grid_spec=pltpu.PrefetchScalarGridSpec(
            num_scalar_prefetch=0,
            grid=(B, H, nq, nk),
            in_specs=[
                pl.BlockSpec((1, 1, Dh, tq), lambda b, h, qi, ki: (b, h, 0, qi)),
                pl.BlockSpec((1, 1, Dh, tk), lambda b, h, qi, ki: (b, h, 0, ki)),
                pl.BlockSpec((1, 1, Dh, tk), lambda b, h, qi, ki: (b, h, 0, ki)),
            ],
            out_specs=pl.BlockSpec((1, 1, Dh, tq), lambda b, h, qi, ki: (b, h, 0, qi)),
            scratch_shapes=[
                pltpu.VMEM((1, tq), jnp.float32),    # running max  m_i
                pltpu.VMEM((1, tq), jnp.float32),    # running sum  l_i
                pltpu.VMEM((Dh, tq), jnp.float32),   # output accumulator
            ],
        ),
        compiler_params=pltpu.CompilerParams(
            dimension_semantics=("parallel", "parallel", "parallel", "arbitrary"),
            vmem_limit_bytes=_VMEM_LIMIT_BYTES,
        ),
    )(q, k, v)

    # (B, H, Dh, L) -> (B, D, L)  (== out.permute(0,1,3,2).reshape(-1, D, L) in PyTorch)
    return out_heads.reshape(B, D, L)


def attention_reference(x, w_qkv, n_heads):
    """Pure-JAX reference mirroring the PyTorch forward."""
    B, D, L = x.shape
    H = n_heads
    Dh = D // H
    scale = float(D) ** (-0.5)
    qkv = jnp.einsum('cd,bdl->bcl', w_qkv[..., 0], x)              # (B, 3D, L)
    q, k, v = jnp.split(qkv, 3, axis=1)
    q = q.reshape(B, H, Dh, L) * scale
    k = k.reshape(B, H, Dh, L)
    v = v.reshape(B, H, Dh, L)
    attn = jax.nn.softmax(jnp.einsum('bhdi,bhdj->bhij', q, k), axis=-1)
    out = jnp.einsum('bhij,bhdj->bhid', attn, v)                   # (B, H, L, Dh)
    return jnp.transpose(out, (0, 1, 3, 2)).reshape(B, D, L)


if __name__ == "__main__":
    B, D, L, H = 2, 32, 128, 4
    key = jax.random.PRNGKey(0)
    kx, kw, kx2 = jax.random.split(key, 3)
    x = jax.random.normal(kx, (B, D, L), dtype=jnp.float32)
    # Conv1d(dim, 3*dim, 1, bias=False) weight: (3*D, D, 1)
    w_qkv = jax.random.normal(kw, (3 * D, D, 1), dtype=jnp.float32) * (1.0 / jnp.sqrt(D))

    ref = attention_reference(x, w_qkv, n_heads=H)

    # f32 path (approx reciprocal in the softmax denominator -> modest tolerance).
    out = jax.block_until_ready(attention_forward(x, w_qkv, n_heads=H))
    assert out.shape == (B, D, L)
    assert jnp.allclose(out, ref, atol=1e-2, rtol=1e-2), "f32 kernel mismatch vs reference"

    # bf16 MXU-operand path (softmax stats / accumulators stay f32) -> looser tolerance.
    out_bf16 = jax.block_until_ready(
        attention_forward(x, w_qkv, n_heads=H, matmul_dtype=jnp.bfloat16))
    assert jnp.allclose(out_bf16, ref, atol=1e-1, rtol=1e-1), "bf16 kernel mismatch vs reference"

    # Multi-tile path: exercises online-softmax accumulation across kv tiles.
    L2 = 256
    x2 = jax.random.normal(kx2, (B, D, L2), dtype=jnp.float32)
    ref2 = attention_reference(x2, w_qkv, n_heads=H)
    out2 = jax.block_until_ready(
        attention_forward(x2, w_qkv, n_heads=H, q_tile=128, kv_tile=128))
    assert jnp.allclose(out2, ref2, atol=1e-2, rtol=1e-2), "tiled kernel mismatch vs reference"

    print("KERNEL_OK")
</pallas_src>

<mosaic_0001>
module attributes {stable_mosaic.version = 11 : i64} {
  func.func @_qkv_proj_kernel(%arg0: i32, %arg1: memref<1x32x128xf32, #tpu.memory_space<vmem>>, %arg2: memref<96x32xf32, #tpu.memory_space<vmem>>, %arg3: memref<1x32x128xf32, #tpu.memory_space<vmem>>, %arg4: memref<1x32x128xf32, #tpu.memory_space<vmem>>, %arg5: memref<1x32x128xf32, #tpu.memory_space<vmem>>) attributes {dimension_semantics = [#tpu.dimension_semantics<parallel>], iteration_bounds = array<i64: 2>, scalar_prefetch = 0 : i64, scratch_operands = 0 : i64, tpu.core_type = #tpu.core_type<tc>, window_params = [{transform_indices = @transform_0, window_bounds = array<i64: 1, 32, 128>}, {pipeline_mode = #tpu.pipeline_mode<synchronous>, transform_indices = @transform_1, window_bounds = array<i64: 96, 32>}, {transform_indices = @transform_2, window_bounds = array<i64: 1, 32, 128>}, {transform_indices = @transform_3, window_bounds = array<i64: 1, 32, 128>}, {transform_indices = @transform_4, window_bounds = array<i64: 1, 32, 128>}]} {
    %c0 = arith.constant 0 : index
    %c0_0 = arith.constant 0 : index
    %c0_1 = arith.constant 0 : index
    %0 = vector.load %arg1[%c0, %c0_0, %c0_1] : memref<1x32x128xf32, #tpu.memory_space<vmem>>, vector<1x32x128xf32>
    %1 = vector.shape_cast %0 : vector<1x32x128xf32> to vector<32x128xf32>
    %c0_2 = arith.constant 0 : index
    %c0_3 = arith.constant 0 : index
    %2 = vector.load %arg2[%c0_2, %c0_3] : memref<96x32xf32, #tpu.memory_space<vmem>>, vector<96x32xf32>
    %cst = arith.constant dense<0.000000e+00> : vector<96x128xf32>
    %3 = tpu.matmul %2, %1, %cst {dimension_numbers = #tpu.dot_dimension_numbers<[1], [0], [0], [1], [0, 0, 1, 1], [], []>} : vector<96x32xf32>, vector<32x128xf32>, vector<96x128xf32> -> vector<96x128xf32>
    %4 = vector.extract_strided_slice %3 {offsets = [0, 0], sizes = [32, 128], strides = [1, 1]} : vector<96x128xf32> to vector<32x128xf32>
    %c0_4 = arith.constant 0 : index
    %c0_5 = arith.constant 0 : index
    %c0_6 = arith.constant 0 : index
    %5 = vector.load %arg3[%c0_4, %c0_5, %c0_6] : memref<1x32x128xf32, #tpu.memory_space<vmem>>, vector<1x32x128xf32>
    %6 = vector.shape_cast %5 : vector<1x32x128xf32> to vector<32x128xf32>
    %7 = vector.shape_cast %4 : vector<32x128xf32> to vector<1x32x128xf32>
    tpu.vector_store %arg3[%c0_4, %c0_5, %c0_6], %7 {strides = array<i32>} : memref<1x32x128xf32, #tpu.memory_space<vmem>>, vector<1x32x128xf32>,
    %8 = vector.extract_strided_slice %3 {offsets = [32, 0], sizes = [32, 128], strides = [1, 1]} : vector<96x128xf32> to vector<32x128xf32>
    %c0_7 = arith.constant 0 : index
    %c0_8 = arith.constant 0 : index
    %c0_9 = arith.constant 0 : index
    %9 = vector.load %arg4[%c0_7, %c0_8, %c0_9] : memref<1x32x128xf32, #tpu.memory_space<vmem>>, vector<1x32x128xf32>
    %10 = vector.shape_cast %9 : vector<1x32x128xf32> to vector<32x128xf32>
    %11 = vector.shape_cast %8 : vector<32x128xf32> to vector<1x32x128xf32>
    tpu.vector_store %arg4[%c0_7, %c0_8, %c0_9], %11 {strides = array<i32>} : memref<1x32x128xf32, #tpu.memory_space<vmem>>, vector<1x32x128xf32>,
    %12 = vector.extract_strided_slice %3 {offsets = [64, 0], sizes = [32, 128], strides = [1, 1]} : vector<96x128xf32> to vector<32x128xf32>
    %c0_10 = arith.constant 0 : index
    %c0_11 = arith.constant 0 : index
    %c0_12 = arith.constant 0 : index
    %13 = vector.load %arg5[%c0_10, %c0_11, %c0_12] : memref<1x32x128xf32, #tpu.memory_space<vmem>>, vector<1x32x128xf32>
    %14 = vector.shape_cast %13 : vector<1x32x128xf32> to vector<32x128xf32>
    %15 = vector.shape_cast %12 : vector<32x128xf32> to vector<1x32x128xf32>
    tpu.vector_store %arg5[%c0_10, %c0_11, %c0_12], %15 {strides = array<i32>} : memref<1x32x128xf32, #tpu.memory_space<vmem>>, vector<1x32x128xf32>,
    return
  }
  func.func @transform_0(%arg0: i32) -> (i32, i32, i32) {
    %c0_i32 = arith.constant 0 : i32
    %c0_i32_0 = arith.constant 0 : i32
    %c0_i32_1 = arith.constant 0 : i32
    return %arg0, %c0_i32, %c0_i32_0 : i32, i32, i32
  }
  func.func @transform_1(%arg0: i32) -> (i32, i32) {
    %c0_i32 = arith.constant 0 : i32
    %c0_i32_0 = arith.constant 0 : i32
    %c0_i32_1 = arith.constant 0 : i32
    return %c0_i32, %c0_i32_0 : i32, i32
  }
  func.func @transform_2(%arg0: i32) -> (i32, i32, i32) {
    %c0_i32 = arith.constant 0 : i32
    %c0_i32_0 = arith.constant 0 : i32
    %c0_i32_1 = arith.constant 0 : i32
    return %arg0, %c0_i32, %c0_i32_0 : i32, i32, i32
  }
  func.func @transform_3(%arg0: i32) -> (i32, i32, i32) {
    %c0_i32 = arith.constant 0 : i32
    %c0_i32_0 = arith.constant 0 : i32
    %c0_i32_1 = arith.constant 0 : i32
    return %arg0, %c0_i32, %c0_i32_0 : i32, i32, i32
  }
  func.func @transform_4(%arg0: i32) -> (i32, i32, i32) {
    %c0_i32 = arith.constant 0 : i32
    %c0_i32_0 = arith.constant 0 : i32
    %c0_i32_1 = arith.constant 0 : i32
    return %arg0, %c0_i32, %c0_i32_0 : i32, i32, i32
  }
}

</mosaic_0001>

<bundles_post_ra>
// kernel: tpu_custom_call.1
= control target key start
LH: loop header
LB: loop body
LE: loop exit
PB: predicated region body
PF: predicated region fallthrough
CT: control target
= control target key end

     0   :  { %10 = vsyncpa [#allocation3], 0  ;;  %s1126_s0 = inlined_call_operand.vmem [shape: f32[2,32,128], index: 0, kind: input, shape index: {}]   ;;  %s1127_s1 = inlined_call_operand.vmem [shape: f32[96,32], index: 1, kind: input, shape index: {}]   ;;  %s1128_s2 = inlined_call_operand.hbm [shape: f32[2,32,128], index: 2, kind: output, shape index: {0}]   ;;  %s1129_s3 = inlined_call_operand.hbm [shape: f32[2,32,128], index: 3, kind: output, shape index: {1}]   ;;  %s1130_s4 = inlined_call_operand.hbm [shape: f32[2,32,128], index: 4, kind: output, shape index: {2}]  }
   0x1   :  { %12 = vsyncpa [#allocation3 + $0x1], 0 }
   0x2   :  { %13 = vsyncpa [#allocation5], 0 }
   0x3   :  { %15 = vsyncpa [#allocation5 + $0x1], 0  ;;  %s878_s15 = smov 0   ;;  %s880_s16 = smov 0  }
   0x4   :  { %s882_s17 = smov 0   ;;  %s884_s18 = smov 0  }
   0x5 LB: > { %s899_s19 = sadd.s32 4294967295, %s846_s18   ;;  %s1131_s20 = sadd.s32 4294967294, %s846_s18   ;;  %s846_s18 = sphi %s884_s18, %s1138_s18   ;;  %s842_s17 = sphi %s882_s17, %s1137_s17   ;;  %s838_s16 = sphi %s880_s16, %s1136_s16   ;;  %s834_s15 = sphi %s878_s15, %s1135_s15  }
   0x6   : > { %s903_s21 = sadd.s32 1, %s846_s18   ;;  %s75_s22 = sadd.s32 1, %s842_s17 }
   0x7   : > { %s72_s23 = ssub.s32 %s846_s18, %s903_s21  ;;  %p85_p0 = scmp.ne.s32.totalorder %s842_s17, %s838_s16 }
   0x8   : > { %p73_p1 = scmp.eq.s32.totalorder %s72_s23, 0  ;;  %p86_p2 = scmp.eq.s32.totalorder %s899_s19, 1 }
   0x9   : > { %p91_p3 = scmp.ne.s32.totalorder %s838_s16, %s834_s15  ;;  %p92_p4 = scmp.eq.s32.totalorder %s1131_s20, 1 }
   0xa   : > { %s916_s24 = scalar_select %p73_p1, %s842_s17, %s75_s22  }
   0xb   : > { %p918_p5 = por %p86_p2, %p85_p0  ;;  %p922_p6 = por %p92_p4, %p91_p3 }
   0xc   : > { %p586_p7 = scmp.ge.s32.totalorder %s846_s18, 1  ;;  %p173_p8 = scmp.lt.s32.totalorder %s846_s18, 3 }
   0xe   : > { %p174_p9 = pnand %p586_p7, %p173_p8 }
   0xf   : > { %p209_p10 = scmp.lt.s32.totalorder (!%p174_p9), %s899_s19, 1  ;;  %v218_v0 = vld [vmem:[%s1127_s1] sm:$0xff] (!%p174_p9)  ;;  %vm230_vm0 = vcmask (!%p174_p9), 261120   ;;  %v224_v1 = vld [vmem:[%s1127_s1 + $0x30] sm:$0xff] (!%p174_p9)  ;;  %v219_v8 = vld [vmem:[%s1127_s1 + $0x8] sm:$0xff] (!%p174_p9)  ;;  %s192_s14 = sand.u32 (!%p174_p9), 1, %s838_s16  }
  0x10   : > { %177 = sbr.rel (%p174_p9) target bundleno = 316 (0x13c), region = 28  ;;  %643 = vmatprep.mubr.msk.f32.mxu0 (!%p174_p9), %vm230_vm0, %v218_v0  ;;  %652 = vmatprep.mubr.msk.f32.mxu1 (!%p174_p9), %vm230_vm0, %v224_v1  ;;  %v225_v9 = vld [vmem:[%s1127_s1 + $0x38] sm:$0xff] (!%p174_p9)  ;;  %v220_v10 = vld [vmem:[%s1127_s1 + $0x10] sm:$0xff] (!%p174_p9)  ;;  %v226_v11 = vld [vmem:[%s1127_s1 + $0x40] sm:$0xff] (!%p174_p9)  ;;  %s587_s22 = sshll.u32 (!%p174_p9), %s192_s14, 5 }
  0x11   : > { %v221_v12 = vld [vmem:[%s1127_s1 + $0x18] sm:$0xff] (!%p174_p9)  ;;  %v227_v13 = vld [vmem:[%s1127_s1 + $0x48] sm:$0xff] (!%p174_p9)  ;;  %v222_v14 = vld [vmem:[%s1127_s1 + $0x20] sm:$0xff] (!%p174_p9)  ;;  %s194_s23 = scalar_lea.vmem (!%p174_p9), [#allocation2], %s587_s22  ;;  %s982_s28 = scalar_lea.vmem (!%p174_p9), [#allocation4], %s587_s22 }
  0x12   : > { %v228_v15 = vld [vmem:[%s1127_s1 + $0x50] sm:$0xff] (!%p174_p9)  ;;  %v223_v16 = vld [vmem:[%s1127_s1 + $0x28] sm:$0xff] (!%p174_p9)  ;;  %v229_v17 = vld [vmem:[%s1127_s1 + $0x58] sm:$0xff] (!%p174_p9)  ;;  %s428_s27 = sshll.u32 (!%p174_p9), %s194_s23, 4  ;;  %s986_s29 = sshll.u32 (!%p174_p9), %s899_s19, 9  ;;  %s988_s27 = int_to_ptr.vmem [resolvable:$true] %s428_s27 }
  0x13   : > { %s444_s30 = sshll.u32 (!%p174_p9), %s982_s28, 4  ;;  %s996_s7 = scalar_lea.hbm (!%p174_p9), %s1128_s2, %s986_s29  ;;  %s1002_s30 = int_to_ptr.vmem [resolvable:$true] %s444_s30 }
  0x14   : > { %s998_s8 = scalar_lea.vmem (!%p174_p9), [#allocation6], %s587_s22  ;;  %s1006_s11 = scalar_lea.sflag (!%p174_p9), [#allocation3], %s192_s14 }
  0x15   : > { %s460_s10 = sshll.u32 (!%p174_p9), %s998_s8, 4  ;;  %s724_s12 = scalar_lea.vmem (!%p174_p9), %s988_s27, 512  ;;  %s1041_s10 = int_to_ptr.vmem [resolvable:$true] %s460_s10 }
  0x16   : > { %p725_p11 = scmp.ne.s32.totalorder (!%p174_p9), %s988_s27, %s724_s12  ;;  %s848_s13 = smov (!%p174_p9), [#allocation2]  }
  0x17   : > { %s210_s5 = scalar_select %p209_p10, %s899_s19, 1 }
  0x18   : > { %p726_p12 = pnand %p725_p11, %p918_p5  ;;  %s728_s22 = sshll.u32 %s848_s13, 4  ;;  %s729_s22 = int_to_ptr.vmem [resolvable:$false] %s728_s22 }
  0x19   : > { %s615_s6 = sshll.u32 %s210_s5, 5  ;;  %s730_s5 = scalar_lea.vmem %s729_s22, 1024 }
  0x1a   : > { %s213_s9 = scalar_lea.vmem %s1126_s0, %s615_s6  ;;  %p727_p13 = pneg %p726_p12 }
  0x1b   : > { %v214_v2 = vld [vmem:[%s213_s9] sm:$0xff]  ;;  %v215_v3 = vld [vmem:[%s213_s9 + $0x8] sm:$0xff]  ;;  %v216_v4 = vld [vmem:[%s213_s9 + $0x10] sm:$0xff]  ;;  %p731_p0 = scmp.lt.s32.totalorder %s988_s27, %s729_s22  ;;  %p732_p1 = scmp.lt.s32.totalorder %s730_s5, %s724_s12 }
  0x1c   : > { %v661_v5 = vpack.c.bf16 %v215_v3, %v214_v2  ;;  %v217_v6 = vld [vmem:[%s213_s9 + $0x18] sm:$0xff]  ;;  %s409_s9 = sand.u32 1, %s899_s19  }
  0x1d   : > { %v665_v7 = vpack.c.bf16 %v217_v6, %v216_v4  ;;  %p733_p2 = por %p732_p1, %p731_p0 }
  0x1e   : > { %662 = vmatprep.subr.bf16.mxu0 %v661_v5  ;;  %669 = vmatprep.subr.bf16.mxu1 %v661_v5 }
  0x1f   : > { %664 = vmatpush3.bf16.msra.mxu0 %v661_v5  ;;  %671 = vmatpush3.bf16.msra.mxu1 %v661_v5  ;;  %p734_p3 = pnand %p733_p2, %p727_p13 }
  0x20   : > { %666 = vmatprep.subr.bf16.mxu0 %v665_v7  ;;  %670 = vmatprep.subr.bf16.mxu1 %v665_v7 }
  0x23   : > { %668 = vmatpush3.bf16.msra.mxu0 %v665_v7  ;;  %672 = vmatpush3.bf16.msra.mxu1 %v665_v7 }
  0x26   : > { %644 = vmatmul.mubr.msk.f32.vlgmr.msra.gmra.mrb[0].mxu0 %vm230_vm0, %v219_v8  ;;  %653 = vmatmul.mubr.msk.f32.vlgmr.msra.gmra.mrb[0].mxu1 %vm230_vm0, %v225_v9 }
  0x27   : > { %646 = vmatprep.mubr.msk.f32.mxu0 %vm230_vm0, %v220_v10  ;;  %655 = vmatprep.mubr.msk.f32.mxu1 %vm230_vm0, %v226_v11 }
  0x2a   : > { %647 = vmatmul.mubr.msk.f32.gmra.mrb[2].mxu0 %vm230_vm0, %v221_v12  ;;  %656 = vmatmul.mubr.msk.f32.gmra.mrb[2].mxu1 %vm230_vm0, %v227_v13 }
  0x2b   : > { %649 = vmatprep.mubr.msk.f32.mxu0 %vm230_vm0, %v222_v14  ;;  %658 = vmatprep.mubr.msk.f32.mxu1 %vm230_vm0, %v228_v15 }
  0x2e   : > { %650 = vmatmul.mubr.msk.f32.gmra.mrb[4].mxu0 %vm230_vm0, %v223_v16  ;;  %659 = vmatmul.mubr.msk.f32.gmra.mrb[4].mxu1 %vm230_vm0, %v229_v17 }
  0xf9   : > { %v645_v18 = vpop.f32.mrb[0].mxu0  ;;  %v654_v19 = vpop.f32.mrb[0].mxu1 }
  0xfa   : > { %393 = vst [vmem:[%s194_s23 + $0x8] sm:$0xff] %v645_v18  ;;  %399 = vst [vmem:[%s982_s28 + $0x18] sm:$0xff] %v654_v19  ;;  %v333_v20 = vpop.f32.mrb[1].mxu0  ;;  %v363_v21 = vpop.f32.mrb[1].mxu1 }
  0xfb   : > { %392 = vst [vmem:[%s194_s23] sm:$0xff] %v333_v20  ;;  %398 = vst [vmem:[%s982_s28 + $0x10] sm:$0xff] %v363_v21 }
  0xfd   : > { %v648_v22 = vpop.f32.mrb[2].mxu0  ;;  %v657_v23 = vpop.f32.mrb[2].mxu1 }
  0xfe   : > { %395 = vst [vmem:[%s194_s23 + $0x18] sm:$0xff] %v648_v22  ;;  %401 = vst [vmem:[%s998_s8 + $0x8] sm:$0xff] %v657_v23  ;;  %v343_v24 = vpop.f32.mrb[3].mxu0  ;;  %v373_v25 = vpop.f32.mrb[3].mxu1 }
  0xff   : > { %394 = vst [vmem:[%s194_s23 + $0x10] sm:$0xff] %v343_v24  ;;  %400 = vst [vmem:[%s998_s8] sm:$0xff] %v373_v25 }
 0x100   : > { %737 = shalt.err (!%p734_p3)
}
 0x101   : > { %s738_s14 = scalar_lea.hbm %s996_s7, 512  ;;  %s742_s13 = scalar_lea.hbm %s1128_s2, 1024 }
 0x102   : > { %p739_p4 = scmp.ne.s32.totalorder %s996_s7, %s738_s14  ;;  %p743_p9 = scmp.lt.u32.totalorder %s996_s7, %s1128_s2 }
 0x103   : > { %p744_p10 = scmp.lt.u32.totalorder %s742_s13, %s738_s14  ;;  %p746_p12 = scmp.lt.u32.totalorder %s738_s14, %s996_s7 }
 0x104   : > { %p740_p7 = pnand %p739_p4, %p918_p5 }
 0x105   : > { %p745_p11 = por %p744_p10, %p743_p9 }
 0x106   : > { %p741_p8 = pneg %p740_p7 }
 0x107   : > { %p747_p13 = por %p746_p12, %p745_p11 }
 0x109   : > { %p748_p0 = pnand %p747_p13, %p741_p8 }
 0x10b   : > { %751 = shalt.err (!%p748_p0)
}
 0x10c   : > { %s849_s12 = smov 128   ;;  %s850_s20 = smov 8   ;;  %v651_v26 = vpop.f32.mrb[4].mxu0  ;;  %v660_v27 = vpop.f32.mrb[4].mxu1 }
 0x10d   : > { %673 = dma.vmem_to_hbm [thread:$0]  (%p918_p5), %s988_s27, 512, %s996_s7, %s1006_s11, %s849_s12, %s849_s12, %s850_s20   ;;  %v353_v28 = vpop.f32.mrb[5].mxu0  ;;  %v383_v29 = vpop.f32.mrb[5].mxu1 }
 0x10e   : > { %s1037_s23 = scalar_lea.hbm %s1129_s3, %s986_s29  ;;  %397 = vst [vmem:[%s982_s28 + $0x8] sm:$0xff] %v651_v26  ;;  %403 = vst [vmem:[%s998_s8 + $0x18] sm:$0xff] %v660_v27  ;;  %s1049_s22 = scalar_lea.hbm %s1130_s4, %s986_s29 }
 0x10f   : > { %396 = vst [vmem:[%s982_s28] sm:$0xff] %v353_v28  ;;  %402 = vst [vmem:[%s998_s8 + $0x10] sm:$0xff] %v383_v29  ;;  %s1055_s27 = scalar_lea.sflag [#allocation5], %s409_s9  ;;  %s752_s7 = scalar_lea.vmem %s1002_s30, 512 }
 0x110   : > { %p753_p1 = scmp.ne.s32.totalorder %s1002_s30, %s752_s7  ;;  %s851_s11 = smov [#allocation4]  }
 0x111   : > { %s756_s5 = sshll.u32 %s851_s11, 4  ;;  %s757_s5 = int_to_ptr.vmem [resolvable:$false] %s756_s5 }
 0x112   : > { %p754_p2 = pnand %p753_p1, %p918_p5  ;;  %s758_s14 = scalar_lea.vmem %s757_s5, 1024 }
 0x113   : > { %p759_p4 = scmp.lt.s32.totalorder %s1002_s30, %s757_s5  ;;  %p760_p7 = scmp.lt.s32.totalorder %s758_s14, %s752_s7 }
 0x114   : > { %p755_p3 = pneg %p754_p2 }
 0x115   : > { %p761_p8 = por %p760_p7, %p759_p4 }
 0x117   : > { %p762_p9 = pnand %p761_p8, %p755_p3 }
 0x119   : > { %765 = shalt.err (!%p762_p9)
}
 0x11a   : > { %s766_s19 = scalar_lea.hbm %s1037_s23, 512  ;;  %s770_s8 = scalar_lea.hbm %s1129_s3, 1024 }
 0x11b   : > { %p767_p10 = scmp.ne.s32.totalorder %s1037_s23, %s766_s19  ;;  %p771_p13 = scmp.lt.u32.totalorder %s1037_s23, %s1129_s3 }
 0x11c   : > { %p772_p0 = scmp.lt.u32.totalorder %s770_s8, %s766_s19  ;;  %p774_p2 = scmp.lt.u32.totalorder %s766_s19, %s1037_s23 }
 0x11d   : > { %p768_p11 = pnand %p767_p10, %p918_p5 }
 0x11e   : > { %p773_p1 = por %p772_p0, %p771_p13 }
 0x11f   : > { %p769_p12 = pneg %p768_p11 }
 0x120   : > { %p775_p3 = por %p774_p2, %p773_p1 }
 0x122   : > { %p776_p4 = pnand %p775_p3, %p769_p12 }
 0x124   : > { %779 = shalt.err (!%p776_p4)
}
 0x125   : > { %674 = dma.vmem_to_hbm [thread:$0]  (%p918_p5), %s1002_s30, 512, %s1037_s23, %s1055_s27, %s849_s12, %s849_s12, %s850_s20  }
 0x126   : > { %s780_s13 = scalar_lea.vmem %s1041_s10, 512  ;;  %s852_s7 = smov [#allocation6]  }
 0x127   : > { %p781_p7 = scmp.ne.s32.totalorder %s1041_s10, %s780_s13  ;;  %s784_s11 = sshll.u32 %s852_s7, 4  ;;  %s785_s11 = int_to_ptr.vmem [resolvable:$false] %s784_s11 }
 0x128   : > { %s786_s5 = scalar_lea.vmem %s785_s11, 1024  ;;  %p787_p10 = scmp.lt.s32.totalorder %s1041_s10, %s785_s11 }
 0x129   : > { %p782_p8 = pnand %p781_p7, %p918_p5  ;;  %p788_p11 = scmp.lt.s32.totalorder %s786_s5, %s780_s13 }
 0x12b   : > { %p783_p9 = pneg %p782_p8  ;;  %p789_p12 = por %p788_p11, %p787_p10 }
 0x12d   : > { %p790_p13 = pnand %p789_p12, %p783_p9 }
 0x12f   : > { %793 = shalt.err (!%p790_p13)
}
 0x130   : > { %s794_s30 = scalar_lea.hbm %s1049_s22, 512  ;;  %s798_s19 = scalar_lea.hbm %s1130_s4, 1024 }
 0x131   : > { %p795_p0 = scmp.ne.s32.totalorder %s1049_s22, %s794_s30  ;;  %p799_p3 = scmp.lt.u32.totalorder %s1049_s22, %s1130_s4 }
 0x132   : > { %p800_p4 = scmp.lt.u32.totalorder %s798_s19, %s794_s30  ;;  %p802_p8 = scmp.lt.u32.totalorder %s794_s30, %s1049_s22 }
 0x133   : > { %p796_p1 = pnand %p795_p0, %p918_p5 }
 0x134   : > { %p801_p7 = por %p800_p4, %p799_p3 }
 0x135   : > { %p797_p2 = pneg %p796_p1 }
 0x136   : > { %p803_p9 = por %p802_p8, %p801_p7 }
 0x138   : > { %p804_p10 = pnand %p803_p9, %p797_p2 }
 0x13a   : > { %807 = shalt.err (!%p804_p10)
}
 0x13b   : > { %675 = dma.vmem_to_hbm [thread:$0]  (%p918_p5), %s1041_s10, 512, %s1049_s22, %s1055_s27, %s849_s12, %s849_s12, %s850_s20  }
 0x13c PF: > { %p689_p11 = scmp.ge.s32.totalorder %s846_s18, 2  ;;  %s475_s8 = sand.u32 1, %s834_s15  }
 0x13d   : > { %s476_s9 = scalar_lea.sflag [#allocation3], %s475_s8 }
 0x13e   : > { %p680_p12 = pnand %p689_p11, %p922_p6 }
 0x140   : > { %825 = dma.done.wait (!%p680_p12), %s476_s9, 512  }
 0x141   : > { %827 = vsyncadd (!%p680_p12), %s476_s9, 4294966784  ;;  %s1134_s25 = sadd.s32 4294967294, %s846_s18  }
 0x142   : > { %s484_s6 = sand.u32 1, %s1134_s25  }
 0x143   : > { %s485_s13 = scalar_lea.sflag [#allocation5], %s484_s6 }
 0x144   : > { %829 = dma.done.wait (!%p680_p12), %s485_s13, 1024  }
 0x145   : > { %831 = vsyncadd (!%p680_p12), %s485_s13, 4294966272  ;;  %p18_p5 = scmp.ge.s32.totalorder %s903_s21, 4   ;;  %s1135_s15 = smov %s838_s16 }
 0x146   : > { %s1136_s16 = smov %s842_s17  ;;  %s1137_s17 = smov %s916_s24 }
 0x147   : > { %s1138_s18 = smov %s903_s21  ;;  %20 = sbr.rel (!%p18_p5) target bundleno = 5 (0x5), region = 95 }
 0x14e   :  { %499 = vsyncpa [#allocation3], 1 }
 0x14f   :  { %501 = vsyncpa [#allocation3 + $0x1], 1 }
 0x150   :  { %502 = vsyncpa [#allocation5], 1 }
 0x151   :  { %504 = vsyncpa [#allocation5 + $0x1], 1 }

</bundles_post_ra>
